<compile_context>
chip_gen: v5e
topology: v5e:2x2
jax: 0.10.0
libtpu: 0.0.40
codegen_flags: <defaults>
</compile_context>

<pallas_src>
import numpy as np
import jax
import jax.numpy as jnp
from jax.experimental import pallas as pl
from jax.experimental.pallas import tpu as pltpu

ALPHA = 1e-5
QUANTS = 256


def _pick_lane_tile(d):
    # Prefer ~512-2048 lanes (>=85% of HBM roofline per measured tiled-add data).
    for td in (512, 1024, 2048, 256, 128):
        if d % td == 0:
            return td
    return d  # fall back to full extent


def dequantization_forward(z_nchw, ldj, noise):
    """Forward (reverse=False) pass of Dequantization.

    z_nchw: [B, C, H, W] integer image, values in [0, QUANTS)
    ldj   : [B] float32 running log-det-jacobian
    noise : [B, C, H, W] float32 uniform noise in [0, 1)  (torch.rand_like equivalent)
    """
    B, C, H, W = z_nchw.shape
    D = C * H * W

    z_flat = z_nchw.reshape(B, D)
    # Reinterpret [0, 256) values as int8 (wrap to [-128, 127]) -> 1 byte/elem reads.
    z_i8 = jnp.where(z_flat >= 128, z_flat - 256, z_flat).astype(jnp.int8)
    u_flat = noise.reshape(B, D).astype(jnp.float32)
    ldj2 = ldj.reshape(B, 1).astype(jnp.float32)

    TB = 32 if B % 32 == 0 else B        # int8 sublane tile = 32, else full extent
    TD = _pick_lane_tile(D)
    grid = (B // TB, D // TD)

    # Constant log-det terms, applied exactly once per sample (not once per D-tile).
    ldj_const = float(np.log(1.0 - ALPHA) * D - np.log(QUANTS) * D)

    def kernel(z_ref, u_ref, ldj_ref, z_out_ref, ldj_out_ref):
        j = pl.program_id(1)

        # int8 -> f32, undoing the wrap-around reinterpretation.
        zf = z_ref[...].astype(jnp.float32)
        zf = jnp.where(zf < 0.0, zf + jnp.float32(256.0), zf)

        # dequant (+ uniform noise, /quants) then pre-logit affine squeeze.
        z = (zf + u_ref[...]) * jnp.float32(1.0 / QUANTS)
        z = z * jnp.float32(1.0 - ALPHA) + jnp.float32(0.5 * ALPHA)

        # Compute each log once; reuse for both outputs.
        lz = jnp.log(z)
        l1z = jnp.log(1.0 - z)

        z_out_ref[...] = lz - l1z

        @pl.when(j == 0)
        def _():
            ldj_out_ref[...] = ldj_ref[...] + jnp.float32(ldj_const)

        ldj_out_ref[...] += jnp.sum(-(lz + l1z), axis=-1, keepdims=True)

    z_out, ldj_out = pl.pallas_call(
        kernel,
        grid=grid,
        in_specs=[
            pl.BlockSpec((TB, TD), lambda i, j: (i, j)),   # z   (int8)
            pl.BlockSpec((TB, TD), lambda i, j: (i, j)),   # noise (f32)
            pl.BlockSpec((TB, 1), lambda i, j: (i, 0)),    # ldj in
        ],
        out_specs=(
            pl.BlockSpec((TB, TD), lambda i, j: (i, j)),   # z out (f32)
            pl.BlockSpec((TB, 1), lambda i, j: (i, 0)),    # ldj out (resident accum)
        ),
        out_shape=(
            jax.ShapeDtypeStruct((B, D), jnp.float32),
            jax.ShapeDtypeStruct((B, 1), jnp.float32),
        ),
        compiler_params=pltpu.CompilerParams(
            dimension_semantics=("parallel", "arbitrary"),
        ),
    )(z_i8, u_flat, ldj2)

    return z_out.reshape(B, C, H, W), ldj_out.reshape(B)


def _reference_forward(z_nchw, ldj, noise):
    """Pure-JAX reference mirroring the PyTorch module (reverse=False)."""
    D = int(np.prod(z_nchw.shape[1:]))
    z = z_nchw.astype(jnp.float32) + noise.astype(jnp.float32)
    z = z / QUANTS
    ldj = ldj - np.log(QUANTS) * D
    z = z * (1.0 - ALPHA) + 0.5 * ALPHA
    ldj = ldj + np.log(1.0 - ALPHA) * D
    ldj = ldj + jnp.sum(-jnp.log(z) - jnp.log(1.0 - z), axis=(1, 2, 3))
    z = jnp.log(z) - jnp.log(1.0 - z)
    return z, ldj


if __name__ == "__main__":
    key = jax.random.PRNGKey(0)
    k_img, k_noise = jax.random.split(key)

    B, C, H, W = 2, 4, 16, 16
    # 8-bit-like discrete image values in [0, QUANTS)
    z = jax.random.randint(k_img, (B, C, H, W), 0, QUANTS, dtype=jnp.int32)
    ldj = jnp.zeros((B,), dtype=jnp.float32)
    noise = jax.random.uniform(k_noise, (B, C, H, W), dtype=jnp.float32)

    z_out, ldj_out = dequantization_forward(z, ldj, noise)
    jax.block_until_ready((z_out, ldj_out))

    z_ref, ldj_ref = _reference_forward(z, ldj, noise)

    assert z_out.shape == (B, C, H, W) and z_out.dtype == jnp.float32
    assert ldj_out.shape == (B,) and ldj_out.dtype == jnp.float32
    assert bool(jnp.all(jnp.isfinite(z_out))) and bool(jnp.all(jnp.isfinite(ldj_out)))
    assert bool(jnp.allclose(z_out, z_ref, rtol=1e-5, atol=1e-4)), "z mismatch vs reference"
    assert bool(jnp.allclose(ldj_out, ldj_ref, rtol=1e-4, atol=0.5)), "ldj mismatch vs reference"
    print("KERNEL_OK")
</pallas_src>

<mosaic_0001>
module attributes {stable_mosaic.version = 11 : i64} {
  func.func @kernel(%arg0: i32, %arg1: i32, %arg2: memref<2x512xi8, #tpu.memory_space<vmem>>, %arg3: memref<2x512xf32, #tpu.memory_space<vmem>>, %arg4: memref<2x1xf32, #tpu.memory_space<vmem>>, %arg5: memref<2x512xf32, #tpu.memory_space<vmem>>, %arg6: memref<2x1xf32, #tpu.memory_space<vmem>>) attributes {dimension_semantics = [#tpu.dimension_semantics<parallel>, #tpu.dimension_semantics<arbitrary>], iteration_bounds = array<i64: 1, 2>, scalar_prefetch = 0 : i64, scratch_operands = 0 : i64, tpu.core_type = #tpu.core_type<tc>, window_params = [{transform_indices = @transform_0, window_bounds = array<i64: 2, 512>}, {transform_indices = @transform_1, window_bounds = array<i64: 2, 512>}, {transform_indices = @transform_2, window_bounds = array<i64: 2, 1>}, {transform_indices = @transform_3, window_bounds = array<i64: 2, 512>}, {transform_indices = @transform_4, window_bounds = array<i64: 2, 1>}]} {
    %c0 = arith.constant 0 : index
    %c0_0 = arith.constant 0 : index
    %0 = vector.load %arg2[%c0, %c0_0] : memref<2x512xi8, #tpu.memory_space<vmem>>, vector<2x512xi8>
    %1 = arith.sitofp %0 : vector<2x512xi8> to vector<2x512xf32>
    %cst = arith.constant 0.000000e+00 : f32
    %2 = vector.broadcast %cst : f32 to vector<2x512xf32>
    %3 = arith.cmpf olt, %1, %2 : vector<2x512xf32>
    %cst_1 = arith.constant 2.560000e+02 : f32
    %4 = vector.broadcast %cst_1 : f32 to vector<2x512xf32>
    %5 = arith.addf %1, %4 : vector<2x512xf32>
    %6 = arith.select %3, %5, %1 : vector<2x512xi1>, vector<2x512xf32>
    %c0_2 = arith.constant 0 : index
    %c0_3 = arith.constant 0 : index
    %7 = vector.load %arg3[%c0_2, %c0_3] : memref<2x512xf32, #tpu.memory_space<vmem>>, vector<2x512xf32>
    %8 = arith.addf %6, %7 : vector<2x512xf32>
    %cst_4 = arith.constant 3.906250e-03 : f32
    %9 = vector.broadcast %cst_4 : f32 to vector<2x512xf32>
    %10 = arith.mulf %8, %9 : vector<2x512xf32>
    %cst_5 = arith.constant 0.999989986 : f32
    %11 = vector.broadcast %cst_5 : f32 to vector<2x512xf32>
    %12 = arith.mulf %10, %11 : vector<2x512xf32>
    %cst_6 = arith.constant 5.000000e-06 : f32
    %13 = vector.broadcast %cst_6 : f32 to vector<2x512xf32>
    %14 = arith.addf %12, %13 : vector<2x512xf32>
    %15 = math.log %14 : vector<2x512xf32>
    %cst_7 = arith.constant 1.000000e+00 : f32
    %16 = vector.broadcast %cst_7 : f32 to vector<2x512xf32>
    %17 = arith.subf %16, %14 : vector<2x512xf32>
    %18 = math.log %17 : vector<2x512xf32>
    %19 = arith.subf %15, %18 : vector<2x512xf32>
    %c0_8 = arith.constant 0 : index
    %c0_9 = arith.constant 0 : index
    %20 = vector.load %arg5[%c0_8, %c0_9] : memref<2x512xf32, #tpu.memory_space<vmem>>, vector<2x512xf32>
    tpu.vector_store %arg5[%c0_8, %c0_9], %19 {strides = array<i32>} : memref<2x512xf32, #tpu.memory_space<vmem>>, vector<2x512xf32>,
    %c0_i32 = arith.constant 0 : i32
    %21 = arith.cmpi eq, %arg1, %c0_i32 : i32
    %22 = arith.extui %21 : i1 to i32
    %c0_i32_10 = arith.constant 0 : i32
    %23 = arith.cmpi ne, %22, %c0_i32_10 : i32
    scf.if %23 {
      %c0_17 = arith.constant 0 : index
      %c0_18 = arith.constant 0 : index
      %32 = vector.load %arg4[%c0_17, %c0_18] : memref<2x1xf32, #tpu.memory_space<vmem>>, vector<2x1xf32>
      %cst_19 = arith.constant -5678.27197 : f32
      %33 = vector.broadcast %cst_19 : f32 to vector<2x1xf32>
      %34 = arith.addf %32, %33 : vector<2x1xf32>
      %c0_20 = arith.constant 0 : index
      %c0_21 = arith.constant 0 : index
      %35 = vector.load %arg6[%c0_20, %c0_21] : memref<2x1xf32, #tpu.memory_space<vmem>>, vector<2x1xf32>
      tpu.vector_store %arg6[%c0_20, %c0_21], %34 {strides = array<i32>} : memref<2x1xf32, #tpu.memory_space<vmem>>, vector<2x1xf32>,
    } else {
    }
    %c0_11 = arith.constant 0 : index
    %c0_12 = arith.constant 0 : index
    %24 = vector.load %arg6[%c0_11, %c0_12] : memref<2x1xf32, #tpu.memory_space<vmem>>, vector<2x1xf32>
    %25 = arith.addf %15, %18 : vector<2x512xf32>
    %cst_13 = arith.constant 0.000000e+00 : f32
    %26 = vector.broadcast %cst_13 : f32 to vector<2x512xf32>
    %27 = arith.subf %26, %25 : vector<2x512xf32>
    %cst_14 = arith.constant dense<0.000000e+00> : vector<2xf32>
    %28 = vector.multi_reduction <add>, %27, %cst_14 [1] : vector<2x512xf32> to vector<2xf32>
    %29 = vector.shape_cast %28 : vector<2xf32> to vector<2x1xf32>
    %30 = arith.addf %24, %29 : vector<2x1xf32>
    %c0_15 = arith.constant 0 : index
    %c0_16 = arith.constant 0 : index
    %31 = vector.load %arg6[%c0_15, %c0_16] : memref<2x1xf32, #tpu.memory_space<vmem>>, vector<2x1xf32>
    tpu.vector_store %arg6[%c0_15, %c0_16], %30 {strides = array<i32>} : memref<2x1xf32, #tpu.memory_space<vmem>>, vector<2x1xf32>,
    return
  }
  func.func @transform_0(%arg0: i32, %arg1: i32) -> (i32, i32) {
    %c0_i32 = arith.constant 0 : i32
    return %arg0, %arg1 : i32, i32
  }
  func.func @transform_1(%arg0: i32, %arg1: i32) -> (i32, i32) {
    %c0_i32 = arith.constant 0 : i32
    return %arg0, %arg1 : i32, i32
  }
  func.func @transform_2(%arg0: i32, %arg1: i32) -> (i32, i32) {
    %c0_i32 = arith.constant 0 : i32
    %c0_i32_0 = arith.constant 0 : i32
    return %arg0, %c0_i32 : i32, i32
  }
  func.func @transform_3(%arg0: i32, %arg1: i32) -> (i32, i32) {
    %c0_i32 = arith.constant 0 : i32
    return %arg0, %arg1 : i32, i32
  }
  func.func @transform_4(%arg0: i32, %arg1: i32) -> (i32, i32) {
    %c0_i32 = arith.constant 0 : i32
    %c0_i32_0 = arith.constant 0 : i32
    return %arg0, %c0_i32 : i32, i32
  }
}

</mosaic_0001>

<bundles_post_ra>
// kernel: tpu_custom_call.1
= control target key start
LH: loop header
LB: loop body
LE: loop exit
PB: predicated region body
PF: predicated region fallthrough
CT: control target
= control target key end

     0   :  { %10 = vsyncpa [#allocation3], 0  ;;  %s999_s0 = inlined_call_operand.hbm [shape: s8[2,1024], index: 0, kind: input, shape index: {}]   ;;  %s1000_s1 = inlined_call_operand.hbm [shape: f32[2,1024], index: 1, kind: input, shape index: {}]   ;;  %s1001_s2 = inlined_call_operand.vmem [shape: f32[2,1], index: 2, kind: input, shape index: {}]   ;;  %s1002_s3 = inlined_call_operand.hbm [shape: f32[2,1024], index: 3, kind: output, shape index: {0}]   ;;  %s1003_s4 = inlined_call_operand.vmem [shape: f32[2,1], index: 4, kind: output, shape index: {1}]  }
   0x1   :  { %12 = vsyncpa [#allocation3 + $0x1], 0 }
   0x2   :  { %13 = vsyncpa [#allocation6], 0 }
   0x3   :  { %15 = vsyncpa [#allocation6 + $0x1], 0 }
   0x4   :  { %16 = vsyncpa [#allocation4], 0 }
   0x5   :  { %18 = vsyncpa [#allocation4 + $0x1], 0  ;;  %s839_s15 = smov 0   ;;  %s841_s16 = smov 0  }
   0x6   :  { %s843_s17 = smov 0   ;;  %s845_s18 = smov 0  }
   0x7   :  { %s847_s19 = smov 0   ;;  %s849_s20 = smov 0  }
   0x8 LB: > { %s568_s21 = sadd.s32 4294967295, %s812_s20   ;;  %s569_s22 = sadd.s32 4294967294, %s812_s20   ;;  %s812_s20 = sphi %s849_s20, %s24_s20   ;;  %s808_s19 = sphi %s847_s19, %s1013_s19   ;;  %s804_s18 = sphi %s845_s18, %s1012_s18   ;;  %s800_s17 = sphi %s843_s17, %s1011_s17   ;;  %s796_s16 = sphi %s841_s16, %s1010_s16   ;;  %s792_s15 = sphi %s839_s15, %s1009_s15  }
   0x9   : > { %s33_s23 = sadd.s32 1, %s808_s19  ;;  %s45_s24 = sadd.s32 1, %s800_s17 }
   0xa   : > { %p34_p0 = scmp.ge.s32.totalorder %s33_s23, 2  ;;  %p52_p1 = scmp.ne.s32.totalorder %s800_s17, %s796_s16 }
   0xb   : > { %p53_p2 = scmp.eq.s32.totalorder %s812_s20, 0  ;;  %p58_p3 = scmp.ne.s32.totalorder %s796_s16, %s792_s15 }
   0xc   : > { %s1015_s23 = smov (%p34_p0, %s33_s23), 0  ;;  %p59_p5 = scmp.eq.s32.totalorder %s568_s21, 0 }
   0xd   : > { %p880_p4 = por %p53_p2, %p52_p1  ;;  %s41_s26 = ssub.s32 %s808_s19, %s1015_s23 }
   0xe   : > { %p138_p6 = scmp.eq.s32.totalorder %s568_s21, 1  ;;  %p43_p7 = scmp.eq.s32.totalorder %s41_s26, 0 }
   0xf   : > { %p886_p8 = por %p59_p5, %p58_p3  ;;  %p144_p10 = scmp.eq.s32.totalorder %s569_s22, 1 }
  0x10   : > { %p890_p9 = por %p138_p6, %p52_p1  ;;  %p572_p12 = scmp.ge.s32.totalorder %s812_s20, 2 }
  0x11   : > { %s895_s29 = scalar_select %p43_p7, %s800_s17, %s45_s24  }
  0x12   : > { %p897_p11 = por %p144_p10, %p58_p3  ;;  %p608_p13 = scmp.lt.s32.totalorder %s812_s20, 2 }
  0x13   : > { %s197_s5 = sand.u32 1, %s800_s17   ;;  %s574_s7 = sshll.u32 %s808_s19, 2 }
  0x14   : > { %s573_s6 = sshll.u32 %s197_s5, 2  ;;  %s207_s10 = scalar_lea.hbm %s999_s0, %s574_s7 }
  0x15   : > { %s201_s11 = scalar_lea.vmem [#allocation2], %s573_s6  ;;  %s209_s13 = sshll.u32 %s207_s10, 4  ;;  %s210_s13 = int_to_ptr.hbm [resolvable:$true] %s209_s13 }
  0x16   : > { %s211_s12 = sshll.u32 %s201_s11, 4  ;;  %p910_p0 = pnand %p608_p13, %p880_p4  ;;  %s212_s12 = int_to_ptr.vmem [resolvable:$true] %s211_s12 }
  0x17   : > { %p578_p1 = scmp.ge.s32.totalorder %s812_s20, 1  ;;  %p238_p2 = scmp.lt.s32.totalorder %s812_s20, 3 }
  0x18   : > { %s198_s21 = scalar_lea.sflag [#allocation3], %s197_s5  ;;  %s575_s22 = sshll.u32 %s197_s5, 3 }
  0x19   : > { %600 = dma.hbm_to_vmem [thread:$0]  (!%p910_p0), %s210_s13, 64, %s212_s12, %s198_s21  }
  0x1a   : > { %p239_p3 = pnand %p578_p1, %p238_p2  ;;  %s589_s24 = sshll.u32 %s808_s19, 3 }
  0x1b   : > { %s229_s7 = scalar_lea.hbm %s1000_s1, %s589_s24  ;;  %s222_s8 = scalar_lea.vmem [#allocation5], %s575_s22 }
  0x1c   : > { %s233_s25 = sshll.u32 %s222_s8, 4  ;;  %s231_s9 = sshll.u32 %s229_s7, 4  ;;  %s234_s25 = int_to_ptr.vmem [resolvable:$true] %s233_s25  ;;  %s232_s9 = int_to_ptr.hbm [resolvable:$true] %s231_s9 }
  0x1d   : > { %s219_s10 = scalar_lea.sflag [#allocation6], %s197_s5  ;;  %242 = sbr.rel (%p239_p3) target bundleno = 218 (0xda), region = 32 }
  0x1e   : > { %603 = dma.hbm_to_vmem [thread:$0]  (!%p910_p0), %s232_s9, 128, %s234_s25, %s219_s10  }
  0x1f   : > { %s925_s11 = sand.u32 (!%p239_p3), 1, %s796_s16  }
  0x20   : > { %s579_s12 = sshll.u32 (!%p239_p3), %s925_s11, 2  ;;  %s245_s13 = scalar_lea.sflag (!%p239_p3), [#allocation3], %s925_s11 }
  0x21   : > { %s248_s21 = scalar_lea.vmem (!%p239_p3), [#allocation2], %s579_s12 }
  0x22   : > { %779 = dma.done.wait (%p886_p8), %s245_s13, 64  }
  0x23   : > { %781 = vsyncadd (%p886_p8), %s245_s13, 4294967232  ;;  %s580_s5 = sshll.u32 %s925_s11, 3  ;;  %s255_s14 = scalar_lea.sflag [#allocation6], %s925_s11 }
  0x24   : > { %s258_s22 = scalar_lea.vmem [#allocation5], %s580_s5 }
  0x25   : > { %783 = dma.done.wait (%p886_p8), %s255_s14, 128  }
  0x26   : > { %785 = vsyncadd (%p886_p8), %s255_s14, 4294967168  ;;  %v319_v0 = vld [vmem:[%s258_s22] sm:$0xff]  ;;  %v308_v1 = vld [vmem:[%s248_s21] sm:$0xf]  ;;  %vm351_vm2 = vcmask 1041408   ;;  %vm353_vm3 = vcmask 1045508  }
  0x27   : > { %321 = vst [vmem:[#allocation1] ss:$2 sm:$0xff] %v319_v0  ;;  %v309_v2 = vunpack.c.0.s8 %v308_v1  ;;  %v310_v3 = vunpack.c.1.s8 %v308_v1  ;;  %vm355_vm4 = vcmask 1043456   ;;  %s290_s27 = scalar_lea.vmem [#allocation7], %s580_s5  ;;  %p582_p4 = scmp.ne.s32.totalorder %s804_s18, 0 }
  0x29   : > { %v311_v4 = vcvt.s32.f32 %v309_v2  ;;  %v312_v5 = vcvt.s32.f32 %v310_v3 }
  0x2b   : > { %vm313_vm0 = vcmp.lt.f32.partialorder %v311_v4, 0.0  ;;  %vm314_vm1 = vcmp.lt.f32.partialorder %v312_v5, 0.0  ;;  %v315_v6 = vadd.f32 256.0, %v311_v4  ;;  %v316_v7 = vadd.f32 256.0, %v312_v5 }
  0x2d   : > { %v317_v8 = vsel %vm313_vm0, %v315_v6, %v311_v4  ;;  %v318_v9 = vsel %vm314_vm1, %v316_v7, %v312_v5 }
  0x2e   : > { %v322_v10 = vld.sshfl [vmem:[#allocation1] sm:$0xff pattern:$0x75643120]  ;;  %v323_v11 = vld.sshfl [vmem:[#allocation1 + $0x8] sm:$0xff pattern:$0x75643120] }
  0x2f   : > { %v326_v12 = vadd.f32 %v322_v10, %v317_v8  ;;  %v327_v13 = vadd.f32 %v323_v11, %v318_v9 }
  0x31   : > { %v328_v14 = vmul.f32 0.00390625, %v326_v12  ;;  %v329_v15 = vmul.f32 0.00390625, %v327_v13 }
  0x33   : > { %v330_v16 = vmul.f32 0.99999, %v328_v14  ;;  %v331_v17 = vmul.f32 0.99999, %v329_v15 }
  0x35   : > { %v332_v18 = vadd.f32 5e-06, %v330_v16  ;;  %v333_v19 = vadd.f32 5e-06, %v331_v17 }
  0x37   : > { %658 = vlog2.f32 %v332_v18  ;;  %v338_v20 = vsub.f32 1.0, %v332_v18  ;;  %v339_v21 = vsub.f32 1.0, %v333_v19 }
  0x38   : > { %660 = vlog2.f32 %v333_v19 }
  0x39   : > { %662 = vlog2.f32 %v338_v20 }
  0x3a   : > { %664 = vlog2.f32 %v339_v21 }
  0x3d   : > { %v659_v22 = vpop.eup %658 }
  0x3e   : > { %v661_v23 = vpop.eup %660  ;;  %v335_v26 = vmul.f32 0.6931472, %v659_v22 }
  0x3f   : > { %v663_v24 = vpop.eup %662  ;;  %v337_v28 = vmul.f32 0.6931472, %v661_v23 }
  0x40   : > { %v665_v25 = vpop.eup %664  ;;  %v341_v27 = vmul.f32 0.6931472, %v663_v24 }
  0x41   : > { %v343_v29 = vmul.f32 0.6931472, %v665_v25 }
  0x42   : > { %v344_v30 = vsub.f32 %v335_v26, %v341_v27 }
  0x43   : > { %v345_v31 = vsub.f32 %v337_v28, %v343_v29 }
  0x44   : > { %v348_v32 = vrot.slane %v344_v30, 2 }
  0x45   : > { %v349_v33 = vrot.slane %v345_v31, 4  ;;  %v350_v34 = vrot.slane %v345_v31, 6  ;;  %362 = sbr.rel (%p582_p4) target bundleno = 78 (0x4e), region = 44 }
  0x46   : > { %v352_v35 = vsel %vm351_vm2, %v344_v30, %v348_v32 }
  0x47   : > { %v354_v36 = vsel %vm353_vm3, %v349_v33, %v350_v34 }
  0x48   : > { %v356_v37 = vsel %vm355_vm4, %v352_v35, %v354_v36 }
  0x49   : > { %358 = vst [vmem:[%s290_s27] sm:$0xff] %v356_v37 }
  0x4a   : > { %v363_v38 = vld [vmem:[%s1001_s2] sm:$0x3]  ;;  %vm365_vm5 = vcmask 1024  }
  0x4b   : > { %v364_v39 = vadd.f32 -5678.272, %v363_v38 }
  0x4d   : > { %366 = vst.msk [vmem:[%s1003_s4] sm:$0x3] %vm365_vm5, %v364_v39 }
  0x4e PF: > { %v368_v40 = vadd.f32 %v341_v27, %v335_v26  ;;  %v369_v41 = vadd.f32 %v343_v29, %v337_v28  ;;  %s590_s8 = sshll.u32 %s804_s18, 3  ;;  %s417_s12 = sshll.u32 %s290_s27, 4  ;;  %s418_s12 = int_to_ptr.vmem [resolvable:$true] %s417_s12 }
  0x4f   : > { %s415_s10 = scalar_lea.hbm %s1002_s3, %s590_s8  ;;  %s398_s18 = scalar_lea.sflag [#allocation4], %s925_s11 }
  0x50   : > { %v370_v42 = vsub.f32 0.0, %v368_v40  ;;  %v371_v43 = vsub.f32 0.0, %v369_v41  ;;  %s419_s13 = sshll.u32 %s415_s10, 4  ;;  %s746_s27 = scalar_lea.hbm %s1002_s3, 16  ;;  %s420_s13 = int_to_ptr.hbm [resolvable:$true] %s419_s13 }
  0x51   : > { %s740_s21 = sshra.s32 %s420_s13, 4  ;;  %s741_s21 = int_to_ptr.hbm [resolvable:$true] %s740_s21 }
  0x52   : > { %374 = vst [vmem:[#allocation1] ss:$2 sm:$0xff] %v370_v42  ;;  %s742_s5 = scalar_lea.hbm %s741_s21, 8  ;;  %p747_p8 = scmp.lt.s32.totalorder %s741_s21, %s1002_s3 }
  0x53   : > { %376 = vst [vmem:[#allocation1 + $0x10] ss:$2 sm:$0xff] %v371_v43  ;;  %p743_p5 = scmp.ne.s32.totalorder %s741_s21, %s742_s5  ;;  %p748_p10 = scmp.lt.s32.totalorder %s746_s27, %s742_s5 }
  0x55   : > { %p744_p6 = pnand %p743_p5, %p890_p9  ;;  %p749_p13 = por %p748_p10, %p747_p8 }
  0x57   : > { %p745_p7 = pneg %p744_p6 }
  0x59   : > { %v377_v44 = vld.sshfl [vmem:[#allocation1] sm:$0xff pattern:$0x75316420]  ;;  %v378_v45 = vld.sshfl [vmem:[#allocation1 + $0x8] sm:$0xff pattern:$0x75316420]  ;;  %p750_p0 = pnand %p749_p13, %p745_p7 }
  0x5a   : > { %v379_v46 = vld.sshfl [vmem:[#allocation1 + $0x10] sm:$0xff pattern:$0x75316420]  ;;  %v380_v47 = vld.sshfl [vmem:[#allocation1 + $0x18] sm:$0xff pattern:$0x75316420] }
  0x5b   : > { %v385_v48 = vsel %vm351_vm2, %v377_v44, 0.0  ;;  %v386_v49 = vsel %vm351_vm2, %v378_v45, 0.0  ;;  %v388_v50 = vsel %vm351_vm2, %v379_v46, 0.0 }
  0x5c   : > { %753 = shalt.err (!%p750_p0)
}
  0x5d   : > { %595 = dma.vmem_to_hbm [thread:$0]  (%p890_p9), %s418_s12, 128, %s420_s13, %s398_s18   ;;  %v387_v51 = vadd.f32 %v386_v49, %v385_v48  ;;  %v390_v52 = vsel %vm351_vm2, %v380_v47, 0.0  ;;  %v367_v55 = vld [vmem:[%s1003_s4] sm:$0x3]  ;;  %vm395_vm6 = vcmask 1024  }
  0x5f   : > { %v389_v53 = vadd.f32 %v388_v50, %v387_v51 }
  0x61   : > { %v391_v54 = vadd.f32 %v390_v52, %v389_v53 }
  0x63   : > { %392 = vadd.xlane.f32.xlu0 %v391_v54 }
  0xd6   : > { %v393_v56 = vpop.xlane.xlu0 %392 }
  0xd7   : > { %v394_v57 = vadd.f32 %v393_v56, %v367_v55 }
  0xd9   : > { %396 = vst.msk [vmem:[%s1003_s4] sm:$0x3] %vm395_vm6, %v394_v57 }
  0xda PF: > { %s441_s28 = sand.u32 1, %s792_s15   ;;  %p605_p9 = pnand %p572_p12, %p897_p11 }
  0xdb   : > { %s442_s25 = scalar_lea.sflag [#allocation4], %s441_s28 }
  0xdc   : > { %p606_p1 = pneg %p605_p9 }
  0xde   : > { %787 = dma.done.wait (%p606_p1), %s442_s25, 128  }
  0xdf   : > { %789 = vsyncadd (%p606_p1), %s442_s25, 4294967168  ;;  %s24_s20 = sadd.s32 1, %s812_s20   ;;  %s1009_s15 = smov %s796_s16 }
  0xe0   : > { %p21_p2 = scmp.ge.s32.totalorder %s24_s20, 4   ;;  %s1010_s16 = smov %s800_s17 }
  0xe1   : > { %s1011_s17 = smov %s895_s29  ;;  %s1012_s18 = smov %s808_s19 }
  0xe2   : > { %s1013_s19 = smov %s1015_s23  ;;  %23 = sbr.rel (!%p21_p2) target bundleno = 8 (0x8), region = 110 }
  0xe7   :  { %448 = vsyncpa [#allocation3], 1 }
  0xe8   :  { %450 = vsyncpa [#allocation3 + $0x1], 1 }
  0xe9   :  { %451 = vsyncpa [#allocation6], 1 }
  0xea   :  { %453 = vsyncpa [#allocation6 + $0x1], 1 }
  0xeb   :  { %454 = vsyncpa [#allocation4], 1 }
  0xec   :  { %456 = vsyncpa [#allocation4 + $0x1], 1 }

</bundles_post_ra>
